<compile_context>
chip_gen: v7x
topology: tpu7x:2x2x1
jax: 0.10.0
libtpu: 0.0.40
codegen_flags: <defaults>
</compile_context>

<pallas_src>
import functools

import jax
import jax.numpy as jnp
from jax import lax
from jax.experimental import pallas as pl
from jax.experimental.pallas import tpu as pltpu


# Contract the lane (last) axis of both operands: G = A @ A^T, no transpose
# materialized, f32 accumulation on the MXU.
_DN = (((1,), (1,)), ((), ()))


def _smooth_l1_mean(g_t, g_x, inv_bc, inv_cc):
    """SmoothL1 (beta=1, 'mean') on normalized Gram difference -> (1, 1)."""
    d = (g_t - g_x) * inv_bc
    ad = jnp.abs(d)
    sl1 = jnp.where(ad < 1.0, 0.5 * d * d, ad - 0.5)
    return jnp.sum(sl1, axis=(0, 1), keepdims=True) * inv_cc


def _kernel_single(t_ref, x_ref, o_ref, *, inv_bc, inv_cc):
    """nk == 1 fast path: whole (C, Hc*W) chunk per grid step; no K loop, no scratch."""
    t = t_ref[...]
    x = x_ref[...]
    # Default MXU precision (f32 accumulate).  Pass precision=lax.Precision.HIGHEST
    # here if bitwise parity with an all-f32 reference matmul is required.
    g_t = lax.dot_general(t, t, _DN, preferred_element_type=jnp.float32)
    g_x = lax.dot_general(x, x, _DN, preferred_element_type=jnp.float32)
    o_ref[...] = _smooth_l1_mean(g_t, g_x, inv_bc, inv_cc)


def _kernel_ktiled(t_ref, x_ref, o_ref, gram_ref, *, inv_bc, inv_cc):
    """K-tiled path: one big-K dot per operand per step, Grams accumulate in VMEM."""
    k = pl.program_id(2)

    @pl.when(k == 0)
    def _init():
        gram_ref[...] = jnp.zeros_like(gram_ref)

    t = t_ref[...]
    x = x_ref[...]
    gram_ref[0] = gram_ref[0] + lax.dot_general(
        t, t, _DN, preferred_element_type=jnp.float32)
    gram_ref[1] = gram_ref[1] + lax.dot_general(
        x, x, _DN, preferred_element_type=jnp.float32)

    @pl.when(k == pl.num_programs(2) - 1)
    def _finalize():
        # SmoothL1 is nonlinear: applied to the FULL Gram only, never per K tile.
        o_ref[...] = _smooth_l1_mean(gram_ref[0], gram_ref[1], inv_bc, inv_cc)


def _kernel_rows(t_ref, x_ref, o_ref, gram_ref, *, inv_bc, inv_cc):
    """Fallback when Hc*W has no 128-multiple divisor: (C, th, W) row tiles."""
    k = pl.program_id(2)

    @pl.when(k == 0)
    def _init():
        gram_ref[...] = jnp.zeros_like(gram_ref)

    th = t_ref.shape[1]

    def body(j, carry):
        tj = t_ref[:, j, :]
        xj = x_ref[:, j, :]
        # Accumulate straight into VMEM scratch so vreg live ranges stay bounded
        # (no (C, C) accumulators carried across a deep unroll).
        gram_ref[0] = gram_ref[0] + lax.dot_general(
            tj, tj, _DN, preferred_element_type=jnp.float32)
        gram_ref[1] = gram_ref[1] + lax.dot_general(
            xj, xj, _DN, preferred_element_type=jnp.float32)
        return carry

    lax.fori_loop(0, th, body, 0, unroll=4)

    @pl.when(k == pl.num_programs(2) - 1)
    def _finalize():
        o_ref[...] = _smooth_l1_mean(gram_ref[0], gram_ref[1], inv_bc, inv_cc)


def _vmem_plan(C):
    """(vmem_limit_bytes, per-input-tile byte budget) sized to the chip's VMEM."""
    try:
        cap = int(pltpu.get_tpu_info().vmem_capacity_bytes)
    except Exception:
        cap = 64 * 1024 * 1024  # assume the smallest per-TC VMEM (v7x) if query fails
    limit = min((cap * 3) // 4, 96 * 1024 * 1024)     # 48 MiB on v7x, 96 MiB on v5e/v6e
    gram_bytes = 2 * C * C * 4
    # 2 inputs x 2 pipeline buffers = 4 live input tiles; keep ~20% of the limit
    # as headroom for Mosaic internal scratch + (tiny) output buffers.
    tile_budget = (limit - gram_bytes) // 5
    tile_budget = max(min(tile_budget, 16 * 1024 * 1024), 1 * 1024 * 1024)
    return limit, tile_budget


def _choose_lane_tile(L_chunk, is_full_axis, C, itemsize, tile_budget):
    """Largest tk along the flattened Hc*W axis: tk | L_chunk and tk % 128 == 0
    (or tk spans the full array axis); biggest candidate fitting the budget."""
    cands = []
    if is_full_axis:
        cands.append(L_chunk)  # full-extent block: exempt from the 128 constraint
    cands += [tk for tk in range(128, L_chunk + 1, 128) if L_chunk % tk == 0]
    if not cands:
        return None
    fitting = [tk for tk in cands if C * tk * itemsize <= tile_budget]
    return max(fitting) if fitting else min(cands)


def _choose_row_tile(Hc, C, W, itemsize, tile_budget):
    """Fallback row tile: multiple of 8 dividing Hc, biggest that fits the budget."""
    cands = [th for th in range(8, Hc + 1, 8) if Hc % th == 0]
    if not cands:
        return None
    fitting = [th for th in cands if C * th * W * itemsize <= tile_budget]
    return max(fitting) if fitting else min(cands)


def style_loss(target, inputs, chunk2, chunk3, loss_weight=1.0):
    """Pallas implementation of Style_Loss.forward(target, input, chunk2, chunk3)."""
    del chunk3  # dead code in the reference module (inner W-chunk result is unused)
    assert target.shape == inputs.shape and target.dtype == inputs.dtype
    N, C, H, W = target.shape
    if H % chunk2 != 0:
        raise ValueError("H must be divisible by chunk2 (torch.chunk even split).")
    Hc = H // chunk2
    L = Hc * W
    itemsize = jnp.dtype(target.dtype).itemsize

    vmem_limit, tile_budget = _vmem_plan(C)
    inv_bc = 1.0 / float(L)
    inv_cc = 1.0 / float(C * C)

    # NOTE(v7x megacore): the leading grid axes (chunk2, N) are "parallel"; with
    # chunk2 * N == 1 the second TensorCore idles (rare edge case, left as-is
    # because the nonlinear SmoothL1 forbids a cheap parallel K split).

    tk = _choose_lane_tile(L, chunk2 == 1, C, itemsize, tile_budget)

    if tk is not None:
        # Fast path: flatten (H, W) -> H*W in the wrapper.  Contiguous trailing
        # dims merge -> metadata-only reshape (no HBM copy, native dtype kept).
        nk = L // tk
        t_in = target.reshape(N, C, H * W)
        x_in = inputs.reshape(N, C, H * W)

        if nk == 1:
            # Whole H-chunk in one step: no K axis, no Gram scratch, no pl.when.
            kernel = functools.partial(_kernel_single, inv_bc=inv_bc, inv_cc=inv_cc)
            in_spec = pl.BlockSpec((None, C, tk), lambda h, n: (n, 0, h))
            out_spec = pl.BlockSpec((None, None, 1, 1), lambda h, n: (h, n, 0, 0))
            grid = (chunk2, N)
            scratch = ()
            semantics = ("parallel", "parallel")
        else:
            kernel = functools.partial(_kernel_ktiled, inv_bc=inv_bc, inv_cc=inv_cc)
            in_spec = pl.BlockSpec((None, C, tk), lambda h, n, k: (n, 0, h * nk + k))
            out_spec = pl.BlockSpec((None, None, 1, 1), lambda h, n, k: (h, n, 0, 0))
            grid = (chunk2, N, nk)
            scratch = (pltpu.VMEM((2, C, C), jnp.float32),)
            semantics = ("parallel", "parallel", "arbitrary")
        operands = (t_in, x_in)
    else:
        # Fallback: Hc*W has no 128-multiple divisor -> keep NCHW, tile H rows.
        if Hc % 8 != 0:
            raise ValueError(
                "H // chunk2 must be a multiple of 8 for the TPU row-tiled "
                "fallback path.")
        th = _choose_row_tile(Hc, C, W, itemsize, tile_budget)
        nk = Hc // th
        kernel = functools.partial(_kernel_rows, inv_bc=inv_bc, inv_cc=inv_cc)
        in_spec = pl.BlockSpec((None, C, th, W), lambda h, n, k: (n, 0, h * nk + k, 0))
        out_spec = pl.BlockSpec((None, None, 1, 1), lambda h, n, k: (h, n, 0, 0))
        grid = (chunk2, N, nk)
        scratch = (pltpu.VMEM((2, C, C), jnp.float32),)
        semantics = ("parallel", "parallel", "arbitrary")
        operands = (target, inputs)

    partial_losses = pl.pallas_call(
        kernel,
        out_shape=jax.ShapeDtypeStruct((chunk2, N, 1, 1), jnp.float32),
        grid_spec=pltpu.PrefetchScalarGridSpec(
            num_scalar_prefetch=0,
            grid=grid,
            in_specs=[in_spec, in_spec],
            out_specs=out_spec,
            scratch_shapes=scratch,
        ),
        compiler_params=pltpu.CompilerParams(
            dimension_semantics=semantics,
            vmem_limit_bytes=vmem_limit,
        ),
    )(*operands)

    # Single final reduction + single loss_weight scale outside the kernel.
    return jnp.sum(partial_losses) * loss_weight


def style_loss_ref(target, inputs, chunk2, chunk3, loss_weight=1.0):
    """Pure-JAX reference mirroring the (as-written) PyTorch forward."""
    N, C, H, W = target.shape
    Hc = H // chunk2
    loss = jnp.float32(0.0)
    for h in range(chunk2):
        ts = target[:, :, h * Hc:(h + 1) * Hc, :]
        xs = inputs[:, :, h * Hc:(h + 1) * Hc, :]
        for n in range(N):
            ft = ts[n].reshape(C, Hc * W).astype(jnp.float32)
            fx = xs[n].reshape(C, Hc * W).astype(jnp.float32)
            gt = ft @ ft.T / (Hc * W)
            gx = fx @ fx.T / (Hc * W)
            d = gt - gx
            ad = jnp.abs(d)
            sl1 = jnp.where(ad < 1.0, 0.5 * d * d, ad - 0.5)
            loss = loss + jnp.mean(sl1) * loss_weight
    return loss


if __name__ == "__main__":
    # Small, module-consistent shapes: NCHW conv-feature maps.
    N, C, H, W = 2, 4, 16, 16
    chunk2, chunk3 = 2, 2
    loss_weight = 1.0

    key = jax.random.PRNGKey(0)
    k_t, k_i = jax.random.split(key)
    target = jax.random.normal(k_t, (N, C, H, W), dtype=jnp.float32)
    inputs = jax.random.normal(k_i, (N, C, H, W), dtype=jnp.float32)

    out = style_loss(target, inputs, chunk2, chunk3, loss_weight)
    out = jax.block_until_ready(out)

    ref = style_loss_ref(target, inputs, chunk2, chunk3, loss_weight)
    assert jnp.allclose(out, ref, rtol=1e-5, atol=1e-5), (out, ref)

    print("KERNEL_OK")
</pallas_src>

<mosaic_0001>
module attributes {stable_mosaic.version = 11 : i64} {
  func.func @_kernel_single(%arg0: i32, %arg1: i32, %arg2: memref<1x4x128xf32, #tpu.memory_space<vmem>>, %arg3: memref<1x4x128xf32, #tpu.memory_space<vmem>>, %arg4: memref<1x1x1x1xf32, #tpu.memory_space<vmem>>) attributes {dimension_semantics = [#tpu.dimension_semantics<parallel>, #tpu.dimension_semantics<parallel>], iteration_bounds = array<i64: 2, 2>, scalar_prefetch = 0 : i64, scratch_operands = 0 : i64, tpu.core_type = #tpu.core_type<tc>, window_params = [{transform_indices = @transform_0, window_bounds = array<i64: 1, 4, 128>}, {transform_indices = @transform_1, window_bounds = array<i64: 1, 4, 128>}, {transform_indices = @transform_2, window_bounds = array<i64: 1, 1, 1, 1>}]} {
    %c0 = arith.constant 0 : index
    %c0_0 = arith.constant 0 : index
    %c0_1 = arith.constant 0 : index
    %0 = vector.load %arg2[%c0, %c0_0, %c0_1] : memref<1x4x128xf32, #tpu.memory_space<vmem>>, vector<1x4x128xf32>
    %1 = vector.shape_cast %0 : vector<1x4x128xf32> to vector<4x128xf32>
    %c0_2 = arith.constant 0 : index
    %c0_3 = arith.constant 0 : index
    %c0_4 = arith.constant 0 : index
    %2 = vector.load %arg3[%c0_2, %c0_3, %c0_4] : memref<1x4x128xf32, #tpu.memory_space<vmem>>, vector<1x4x128xf32>
    %3 = vector.shape_cast %2 : vector<1x4x128xf32> to vector<4x128xf32>
    %cst = arith.constant dense<0.000000e+00> : vector<4x4xf32>
    %4 = tpu.matmul %1, %1, %cst {dimension_numbers = #tpu.dot_dimension_numbers<[1], [1], [0], [0], [0, 0, 1, 0], [], []>} : vector<4x128xf32>, vector<4x128xf32>, vector<4x4xf32> -> vector<4x4xf32>
    %cst_5 = arith.constant dense<0.000000e+00> : vector<4x4xf32>
    %5 = tpu.matmul %3, %3, %cst_5 {dimension_numbers = #tpu.dot_dimension_numbers<[1], [1], [0], [0], [0, 0, 1, 0], [], []>} : vector<4x128xf32>, vector<4x128xf32>, vector<4x4xf32> -> vector<4x4xf32>
    %6 = arith.subf %4, %5 : vector<4x4xf32>
    %cst_6 = arith.constant 7.812500e-03 : f32
    %7 = vector.broadcast %cst_6 : f32 to vector<4x4xf32>
    %8 = arith.mulf %6, %7 : vector<4x4xf32>
    %9 = math.absf %8 : vector<4x4xf32>
    %cst_7 = arith.constant 1.000000e+00 : f32
    %10 = vector.broadcast %cst_7 : f32 to vector<4x4xf32>
    %11 = arith.cmpf olt, %9, %10 : vector<4x4xf32>
    %cst_8 = arith.constant 5.000000e-01 : f32
    %12 = vector.broadcast %cst_8 : f32 to vector<4x4xf32>
    %13 = arith.mulf %12, %8 : vector<4x4xf32>
    %14 = arith.mulf %13, %8 : vector<4x4xf32>
    %cst_9 = arith.constant 5.000000e-01 : f32
    %15 = vector.broadcast %cst_9 : f32 to vector<4x4xf32>
    %16 = arith.subf %9, %15 : vector<4x4xf32>
    %17 = arith.select %11, %14, %16 : vector<4x4xi1>, vector<4x4xf32>
    %18 = vector.shape_cast %17 : vector<4x4xf32> to vector<1x4x4xf32>
    %cst_10 = arith.constant dense<0.000000e+00> : vector<1xf32>
    %19 = vector.multi_reduction <add>, %18, %cst_10 [1, 2] : vector<1x4x4xf32> to vector<1xf32>
    %20 = vector.shape_cast %19 : vector<1xf32> to vector<1x1x1xf32>
    %21 = vector.extract %20[0, 0, 0] : f32 from vector<1x1x1xf32>
    %22 = vector.broadcast %21 : f32 to vector<1x1xf32>
    %cst_11 = arith.constant 6.250000e-02 : f32
    %23 = vector.broadcast %cst_11 : f32 to vector<1x1xf32>
    %24 = arith.mulf %22, %23 : vector<1x1xf32>
    %c0_12 = arith.constant 0 : index
    %c0_13 = arith.constant 0 : index
    %c0_14 = arith.constant 0 : index
    %c0_15 = arith.constant 0 : index
    %25 = vector.load %arg4[%c0_12, %c0_13, %c0_14, %c0_15] : memref<1x1x1x1xf32, #tpu.memory_space<vmem>>, vector<1x1x1x1xf32>
    %26 = vector.shape_cast %25 : vector<1x1x1x1xf32> to vector<1x1xf32>
    %27 = vector.shape_cast %24 : vector<1x1xf32> to vector<1x1x1x1xf32>
    tpu.vector_store %arg4[%c0_12, %c0_13, %c0_14, %c0_15], %27 {strides = array<i32>} : memref<1x1x1x1xf32, #tpu.memory_space<vmem>>, vector<1x1x1x1xf32>,
    return
  }
  func.func @transform_0(%arg0: i32, %arg1: i32) -> (i32, i32, i32) {
    %c0_i32 = arith.constant 0 : i32
    %c0_i32_0 = arith.constant 0 : i32
    return %arg1, %c0_i32, %arg0 : i32, i32, i32
  }
  func.func @transform_1(%arg0: i32, %arg1: i32) -> (i32, i32, i32) {
    %c0_i32 = arith.constant 0 : i32
    %c0_i32_0 = arith.constant 0 : i32
    return %arg1, %c0_i32, %arg0 : i32, i32, i32
  }
  func.func @transform_2(%arg0: i32, %arg1: i32) -> (i32, i32, i32, i32) {
    %c0_i32 = arith.constant 0 : i32
    %c0_i32_0 = arith.constant 0 : i32
    %c0_i32_1 = arith.constant 0 : i32
    return %arg0, %arg1, %c0_i32, %c0_i32_0 : i32, i32, i32, i32
  }
}

</mosaic_0001>

<bundles_post_ra>
// kernel: tpu_custom_call.1
= control target key start
LH: loop header
LB: loop body
LE: loop exit
PB: predicated region body
PF: predicated region fallthrough
CT: control target
= control target key end

     0   :  { %7 = vsyncpa [#allocation3], 0  ;;  %s966_s0 = inlined_call_operand.hbm [shape: f32[2,4,256], index: 0, kind: input, shape index: {}]   ;;  %s967_s1 = inlined_call_operand.hbm [shape: f32[2,4,256], index: 1, kind: input, shape index: {}]   ;;  %s968_s2 = inlined_call_operand.vmem [shape: f32[2,2,1,1], index: 2, kind: output, shape index: {}]  }
   0x1   :  { %9 = vsyncpa [#allocation3 + $0x1], 0 }
   0x2   :  { %10 = vsyncpa [#allocation5], 0 }
   0x3   :  { %12 = vsyncpa [#allocation5 + $0x1], 0  ;;  %s764_s9 = smov 0   ;;  %s766_s10 = smov 0  }
   0x4   :  { %s768_s11 = smov 0   ;;  %s770_s12 = smov 0  }
   0x5   :  { %s772_s13 = smov 0   ;;  %s774_s14 = smov 0  }
   0x6   :  { %s776_s15 = smov 0   ;;  %s778_s16 = smov 0  }
   0x7 LB: > { %s502_s17 = sadd.s32 4294967295, %s743_s16   ;;  %s27_s18 = sadd.s32 1, %s735_s14  ;;  %s743_s16 = sphi %s778_s16, %s18_s16   ;;  %s739_s15 = sphi %s776_s15, %s984_s15   ;;  %s735_s14 = sphi %s774_s14, %s983_s14   ;;  %s731_s13 = sphi %s772_s13, %s982_s13   ;;  %s727_s12 = sphi %s770_s12, %s981_s12   ;;  %s723_s11 = sphi %s768_s11, %s980_s11   ;;  %s719_s10 = sphi %s766_s10, %s979_s10   ;;  %s715_s9 = sphi %s764_s9, %s978_s9  }
   0x8   : > { %p28_p0 = scmp.ge.s32.totalorder %s27_s18, 2  ;;  %s30_s19 = sadd.s32 1, %s739_s15 }
   0x9   : > { %s39_s20 = sadd.s32 1, %s723_s11  ;;  %p46_p1 = scmp.ne.s32.totalorder %s723_s11, %s719_s10 }
   0xa   : > { %s986_s18 = smov (%p28_p0, %s27_s18), 0  ;;  %s988_s19 = smov (!%p28_p0, %s30_s19), %s739_s15 }
   0xb   : > { %s34_s21 = ssub.s32 %s735_s14, %s986_s18  ;;  %p47_p2 = scmp.eq.s32.totalorder %s743_s16, 0 }
   0xc   : > { %p32_p3 = scmp.ge.s32.totalorder %s988_s19, 2  ;;  %p52_p4 = scmp.ne.s32.totalorder %s719_s10, %s715_s9 }
   0xd   : > { %p815_p5 = por %p47_p2, %p46_p1  ;;  %p53_p6 = scmp.eq.s32.totalorder %s502_s17, 0 }
   0xe   : > { %s990_s19 = smov (%p32_p3, %s988_s19), 0  ;;  %p546_p8 = scmp.lt.s32.totalorder %s743_s16, 4 }
   0xf   : > { %p821_p7 = por %p53_p6, %p52_p4  ;;  %s35_s24 = ssub.s32 %s739_s15, %s990_s19 }
  0x10   : > { %s36_s25 = sor.u32 %s35_s24, %s34_s21  ;;  %s829_s26 = sand.u32 1, %s723_s11  }
  0x11   : > { %s971_s23 = scalar_select %p821_p7, 1, 0 }
  0x12   : > { %p37_p9 = scmp.eq.s32.totalorder %s36_s25, 0  ;;  %s506_s27 = sshll.u32 %s829_s26, 2 }
  0x13   : > { %s507_s28 = sshll.u32 %s735_s14, 1  ;;  %s136_s4 = scalar_lea.vmem [#allocation2], %s506_s27 }
  0x14   : > { %s834_s29 = scalar_select %p37_p9, %s723_s11, %s39_s20  }
  0x15   : > { %s837_s30 = sadd.s32 %s739_s15, %s507_s28  ;;  %s145_s5 = sshll.u32 %s136_s4, 4  ;;  %s849_s5 = int_to_ptr.vmem [resolvable:$true] %s145_s5 }
  0x16   : > { %s508_s3 = sshll.u32 %s837_s30, 6  ;;  %p855_p10 = pnand %p546_p8, %p815_p5 }
  0x17   : > { %s847_s8 = scalar_lea.hbm %s966_s0, %s508_s3  ;;  %s133_s17 = scalar_lea.sflag [#allocation3], %s829_s26 }
  0x18   : > { %s613_s20 = scalar_lea.hbm %s847_s8, 64  ;;  %p615_p0 = pneg %p855_p10 }
  0x19   : > { %p614_p13 = scmp.ne.s32.totalorder %s847_s8, %s613_s20  ;;  %s618_s24 = scalar_lea.hbm %s966_s0, 256 }
  0x1a   : > { %p619_p3 = scmp.lt.u32.totalorder %s847_s8, %s966_s0  ;;  %p620_p4 = scmp.lt.u32.totalorder %s618_s24, %s613_s20 }
  0x1b   : > { %p616_p1 = pnand %p615_p0, %p614_p13  ;;  %p622_p6 = scmp.lt.u32.totalorder %s613_s20, %s847_s8 }
  0x1c   : > { %p621_p5 = por %p620_p4, %p619_p3 }
  0x1d   : > { %p617_p2 = pneg %p616_p1 }
  0x1e   : > { %p623_p8 = por %p622_p6, %p621_p5 }
  0x20   : > { %p624_p9 = pnand %p623_p8, %p617_p2 }
  0x22   : > { %627 = shalt.err (!%p624_p9)
}
  0x23   : > { %s628_s4 = scalar_lea.vmem %s849_s5, 64  ;;  %s745_s6 = smov [#allocation2]  }
  0x24   : > { %p629_p13 = scmp.ne.s32.totalorder %s849_s5, %s628_s4  ;;  %s633_s7 = sshll.u32 %s745_s6, 4  ;;  %s634_s7 = int_to_ptr.vmem [resolvable:$false] %s633_s7 }
  0x25   : > { %s635_s21 = scalar_lea.vmem %s634_s7, 128  ;;  %p636_p12 = scmp.lt.s32.totalorder %s849_s5, %s634_s7 }
  0x26   : > { %p631_p1 = pnand %p629_p13, %p615_p0  ;;  %p637_p3 = scmp.lt.s32.totalorder %s635_s21, %s628_s4 }
  0x28   : > { %p632_p11 = pneg %p631_p1  ;;  %p638_p4 = por %p637_p3, %p636_p12 }
  0x2a   : > { %p639_p5 = pnand %p638_p4, %p632_p11 }
  0x2c   : > { %642 = shalt.err (!%p639_p5)
}
  0x2d   : > { %542 = dma.hbm_to_vmem [thread:$0]  (!%p855_p10), %s847_s8, 64, %s849_s5, %s133_s17  }
  0x2e   : > { %p973_p2 = scmp.lt.s32.totalorder %s743_s16, 5  ;;  %p974_p6 = scmp.ge.s32.totalorder %s743_s16, 1 }
  0x2f   : > { %s900_s25 = scalar_lea.hbm %s967_s1, %s508_s3  ;;  %s156_s28 = scalar_lea.vmem [#allocation4], %s506_s27 }
  0x30   : > { %p891_p8 = pnand %p974_p6, %p973_p2  ;;  %s165_s4 = sshll.u32 %s156_s28, 4  ;;  %s166_s4 = int_to_ptr.vmem [resolvable:$true] %s165_s4 }
  0x31   : > { %s153_s5 = scalar_lea.sflag [#allocation5], %s829_s26  ;;  %s643_s8 = scalar_lea.hbm %s900_s25, 64 }
  0x32   : > { %s975_s20 = scalar_select %p891_p8, 1, 0 }
  0x33   : > { %p644_p11 = scmp.ne.s32.totalorder %s900_s25, %s643_s8  ;;  %s648_s3 = scalar_lea.hbm %s967_s1, 256 }
  0x34   : > { %p649_p13 = scmp.lt.u32.totalorder %s900_s25, %s967_s1  ;;  %p650_p1 = scmp.lt.u32.totalorder %s648_s3, %s643_s8 }
  0x35   : > { %p646_p12 = pnand %p644_p11, %p615_p0  ;;  %p652_p4 = scmp.lt.u32.totalorder %s643_s8, %s900_s25 }
  0x36   : > { %p651_p3 = por %p650_p1, %p649_p13 }
  0x37   : > { %p647_p9 = pneg %p646_p12 }
  0x38   : > { %p653_p5 = por %p652_p4, %p651_p3 }
  0x3a   : > { %p654_p2 = pnand %p653_p5, %p647_p9 }
  0x3c   : > { %657 = shalt.err (!%p654_p2)
}
  0x3d   : > { %s658_s26 = scalar_lea.vmem %s166_s4, 64  ;;  %s746_s27 = smov [#allocation4]  }
  0x3e   : > { %p659_p6 = scmp.ne.s32.totalorder %s166_s4, %s658_s26  ;;  %s663_s21 = sshll.u32 %s746_s27, 4  ;;  %s664_s21 = int_to_ptr.vmem [resolvable:$false] %s663_s21 }
  0x3f   : > { %s665_s22 = scalar_lea.vmem %s664_s21, 128  ;;  %p666_p7 = scmp.lt.s32.totalorder %s166_s4, %s664_s21 }
  0x40   : > { %p661_p11 = pnand %p659_p6, %p615_p0  ;;  %p667_p8 = scmp.lt.s32.totalorder %s665_s22, %s658_s26 }
  0x42   : > { %p662_p12 = pneg %p661_p11  ;;  %p668_p1 = por %p667_p8, %p666_p7 }
  0x44   : > { %p669_p13 = pnand %p668_p1, %p662_p12 }
  0x46   : > { %672 = shalt.err (!%p669_p13)
}
  0x47   : > { %545 = dma.hbm_to_vmem [thread:$0]  (!%p855_p10), %s900_s25, 64, %s166_s4, %s153_s5  }
  0x48   : > { %p976_p9 = scmp.ne.s32.totalorder %s975_s20, 0 }
  0x49   : > { %s176_s24 = sand.u32 (!%p976_p9), 1, %s719_s10   ;;  %p977_p0 = scmp.ne.s32.totalorder (!%p976_p9), %s971_s23, 0 }
  0x4a   : > { %174 = sbr.rel (%p976_p9) target bundleno = 520 (0x208), region = 28  ;;  %s513_s28 = sshll.u32 (!%p976_p9), %s176_s24, 2 }
  0x4b   : > { %s177_s8 = scalar_lea.sflag (!%p976_p9), [#allocation3], %s176_s24  ;;  %s180_s30 = scalar_lea.vmem (!%p976_p9), [#allocation2], %s513_s28 }
  0x51   : > { %706 = dma.done.wait (%p977_p0), %s177_s8, 64  }
  0x52   : > { %708 = vsyncadd (%p977_p0), %s177_s8, 4294967232  ;;  %s186_s17 = scalar_lea.sflag [#allocation5], %s176_s24  ;;  %s189_s3 = scalar_lea.vmem [#allocation4], %s513_s28 }
  0x53   : > { %710 = dma.done.wait (%p977_p0), %s186_s17, 64  }
  0x54   : > { %712 = vsyncadd (%p977_p0), %s186_s17, 4294967232  ;;  %v747_v0 = vmov 0.0   ;;  %vm748_vm0 = vmmov 0   ;;  %v224_v1 = vld [vmem:[%s180_s30] sm:$0xf]  ;;  %vm374_vm2 = vcmask 27648  }
  0x55   : > { %523 = vmatprep.subr.mxu0 %v747_v0  ;;  %528 = vmatprep.subr.mxu1 %v747_v0  ;;  %v225_v2 = vld [vmem:[%s189_s3] sm:$0xf]  ;;  %p217_p7 = scmp.lt.s32.totalorder %s731_s13, 1  ;;  %p219_p10 = scmp.lt.s32.totalorder %s727_s12, 1  ;;  %vm387_vm3 = vcmask 0  }
  0x56   : > { %525 = vmatprep.mubr.msk.f32.mxu0 %vm748_vm0, %v747_v0  ;;  %530 = vmatprep.mubr.msk.f32.mxu1 %vm748_vm0, %v747_v0 }
  0x57   : > { %524 = vmatpush3.xpose.msra.mxu0 %v224_v1  ;;  %529 = vmatpush3.xpose.msra.mxu1 %v225_v2  ;;  %s992_s13 = smov (!%p217_p7, %s731_s13), 1  ;;  %s994_s12 = smov (!%p219_p10, %s727_s12), 1 }
  0x58   : > { %s515_s23 = sshll.u32 %s992_s13, 1 }
  0x59   : > { %s222_s9 = sadd.s32 %s515_s23, %s994_s12 }
  0x5a   : > { %526 = vmatmul.mubr.f32.vlgmr.msra.gmra.mrb[0].mxu0 %v224_v1  ;;  %531 = vmatmul.mubr.f32.vlgmr.msra.gmra.mrb[0].mxu1 %v225_v2  ;;  %s223_s5 = scalar_lea.vmem %s968_s2, %s222_s9 }
 0x12d   : > { %v292_v3 = vpop.f32.mrb[0].mxu0  ;;  %v362_v4 = vpop.f32.mrb[0].mxu1 }
 0x12e   : > { %v366_v5 = vsub.f32 %v292_v3, %v362_v4  ;;  %v527_v6 = vpop.f32.mrb[1].mxu0  ;;  %v532_v7 = vpop.f32.mrb[1].mxu1 }
 0x130   : > { %v367_v8 = vmul.f32 0.0078125, %v366_v5 }
 0x132   : > { %v370_v9 = vmul.f32 0.5, %v367_v8  ;;  %v368_v10 = vand.u32 2147483647, %v367_v8 }
 0x134   : > { %vm369_vm1 = vcmp.lt.f32.partialorder %v368_v10, 1.0  ;;  %v371_v11 = vmul.f32 %v370_v9, %v367_v8  ;;  %v516_v12 = vadd.f32 -0.5, %v368_v10 }
 0x136   : > { %v373_v13 = vsel %vm369_vm1, %v371_v11, %v516_v12 }
 0x137   : > { %v375_v14 = vsel %vm374_vm2, %v373_v13, 0.0 }
 0x138   : > { %376 = vadd.xlane.f32.xlu0 %v375_v14 }
 0x1c5   : > { %v377_v15 = vpop.xlane.xlu0 %376 }
 0x1c6   : > { %v378_v16 = vrot.slane %v377_v15, 4 }
 0x1c8   : > { %v379_v17 = vadd.f32 %v378_v16, %v377_v15 }
 0x1ca   : > { %v380_v18 = vrot.slane %v379_v17, 2 }
 0x1cc   : > { %v381_v19 = vadd.f32 %v380_v18, %v379_v17 }
 0x1ce   : > { %v382_v20 = vrot.slane %v381_v19, 1 }
 0x1d0   : > { %v383_v21 = vadd.f32 %v382_v20, %v381_v19 }
 0x1d2   : > { %533 = vpush %v383_v21 }
 0x203   : > { %s534_s20 = spop %533 }
 0x204   : > { %v385_v22 = vstv %s534_s20 }
 0x205   : > { %v386_v23 = vmul.f32 0.0625, %v385_v22 }
 0x207   : > { %388 = vst.msk [vmem:[%s223_s5] sm:$0x1] %vm387_vm3, %v386_v23 }
 0x208 PF: > { %s18_s16 = sadd.s32 1, %s743_s16   ;;  %s978_s9 = smov %s719_s10 }
 0x209   : > { %p15_p8 = scmp.ge.s32.totalorder %s18_s16, 6   ;;  %s979_s10 = smov %s723_s11 }
 0x20a   : > { %s980_s11 = smov %s834_s29  ;;  %s981_s12 = smov %s735_s14 }
 0x20b   : > { %s982_s13 = smov %s739_s15  ;;  %s983_s14 = smov %s986_s18 }
 0x20c   : > { %s984_s15 = smov %s990_s19  ;;  %17 = sbr.rel (!%p15_p8) target bundleno = 7 (0x7), region = 81 }
 0x213   :  { %414 = vsyncpa [#allocation3], 1 }
 0x214   :  { %416 = vsyncpa [#allocation3 + $0x1], 1 }
 0x215   :  { %417 = vsyncpa [#allocation5], 1 }
 0x216   :  { %419 = vsyncpa [#allocation5 + $0x1], 1 }

</bundles_post_ra>
